<compile_context>
chip_gen: v5e
topology: v5e:2x2
jax: 0.10.0
libtpu: 0.0.40
codegen_flags: <defaults>
</compile_context>

<pallas_src>
import jax
import jax.numpy as jnp
from jax.experimental import pallas as pl
from jax.experimental.pallas import tpu as pltpu


def _fused_1x1_softmax_kernel(x_ref, wf_ref, bf_ref, w2_ref, b2_ref, o_ref):
    # x_ref : (1, C_in, TM)   NCHW pixel tile (sublanes = channels, lanes = pixels)
    # wf_ref: (C_mid, C_in)   folded (conv1x1 then convT1x1) weight
    # bf_ref: (C_mid, 1)      folded bias
    # w2_ref: (C_out, C_mid)  final 1x1 conv weight
    # b2_ref: (C_out, 1)
    # o_ref : (1, C_out, TM)
    x = x_ref[0]                                                        # (C_in, TM)
    h = jnp.dot(wf_ref[...], x, preferred_element_type=jnp.float32) + bf_ref[...]
    h = jnp.maximum(h, 0.0)
    h = jnp.dot(w2_ref[...], h, preferred_element_type=jnp.float32) + b2_ref[...]
    # softmax over the channel axis (axis 0); each pixel (lane) is independent,
    # so garbage lanes in a padded edge tile never contaminate valid lanes.
    m = jnp.max(h, axis=0, keepdims=True)
    e = jnp.exp(h - m)
    s = jnp.sum(e, axis=0, keepdims=True)
    o_ref[0] = (e * pl.reciprocal(s, approx=True)).astype(o_ref.dtype)


def fused_model_forward(x_nchw, params, *, tm=1024, out_dtype=jnp.float32):
    """x_nchw: (N, 10, H, W) float32 -> (N, 200, H, W) out_dtype (NCHW, like PyTorch)."""
    w1, b1, wt, bt, w2, b2 = params
    N, C_in, H, W = x_nchw.shape
    C_mid = w1.shape[0]          # 8
    C_out = w2.shape[0]          # 200
    HW = H * W

    # Fold conv1x1 -> convT1x1 at trace time (exact; ReLU follows both).
    #   y2 = Wt^T (W1 x + b1) + bt = (Wt^T W1) x + (Wt^T b1 + bt)
    wf = wt.T @ w1                                   # (C_mid, C_in)
    bf = (wt.T @ b1 + bt)[:, None]                   # (C_mid, 1)
    b2c = b2[:, None]                                # (C_out, 1)

    x3 = x_nchw.reshape(N, C_in, HW)                 # free reshape, stays NCHW

    # Row-of-pixels tile: large & lane-dense. If one image fits, use the full
    # spatial extent (no divisibility constraint when block == full dim).
    if HW <= tm:
        tm_eff = HW
    else:
        assert tm % 128 == 0, "tm must be a multiple of 128 when tiling the pixel axis"
        tm_eff = tm
    ghw = pl.cdiv(HW, tm_eff)
    grid = (N, ghw)

    full = lambda n, j: (0, 0)

    out3 = pl.pallas_call(
        _fused_1x1_softmax_kernel,
        out_shape=jax.ShapeDtypeStruct((N, C_out, HW), out_dtype),
        grid_spec=pltpu.PrefetchScalarGridSpec(
            num_scalar_prefetch=0,
            grid=grid,
            in_specs=[
                pl.BlockSpec((1, C_in, tm_eff), lambda n, j: (n, 0, j)),  # x tile
                pl.BlockSpec((C_mid, C_in), full),                        # folded W
                pl.BlockSpec((C_mid, 1), full),                           # folded b
                pl.BlockSpec((C_out, C_mid), full),                       # W2
                pl.BlockSpec((C_out, 1), full),                           # b2
            ],
            out_specs=pl.BlockSpec((1, C_out, tm_eff), lambda n, j: (n, 0, j)),
        ),
        compiler_params=pltpu.CompilerParams(
            dimension_semantics=("parallel", "parallel"),
        ),
    )(x3, wf, bf, w2, b2c)

    return out3.reshape(N, C_out, H, W)              # free reshape (already NCHW)


def init_params(key):
    """Deterministic parameter init mirroring the module's shapes (PyTorch conventions).

    Conv2d(10, 8, 1):           weight (8, 10), bias (8,)
    ConvTranspose2d(8, 8, 1):   weight (8, 8) [in, out], bias (8,)   [in_channels fixed to 8]
    Conv2d(8, 200, 1):          weight (200, 8), bias (200,)
    """
    k1, k2, k3, k4, k5, k6 = jax.random.split(key, 6)
    scale = 0.1
    w1 = scale * jax.random.normal(k1, (8, 10), jnp.float32)
    b1 = scale * jax.random.normal(k2, (8,), jnp.float32)
    wt = scale * jax.random.normal(k3, (8, 8), jnp.float32)
    bt = scale * jax.random.normal(k4, (8,), jnp.float32)
    w2 = scale * jax.random.normal(k5, (200, 8), jnp.float32)
    b2 = scale * jax.random.normal(k6, (200,), jnp.float32)
    return (w1, b1, wt, bt, w2, b2)


def reference_forward(x_nchw, params):
    """Pure-JAX reference of the unfused chain (same math, no Pallas)."""
    w1, b1, wt, bt, w2, b2 = params
    v1 = jnp.einsum('oc,nchw->nohw', w1, x_nchw) + b1[None, :, None, None]
    v2 = jnp.einsum('io,nihw->nohw', wt, v1) + bt[None, :, None, None]
    v3 = jnp.maximum(v2, 0.0)
    v4 = jnp.einsum('oc,nchw->nohw', w2, v3) + b2[None, :, None, None]
    return jax.nn.softmax(v4, axis=1)


if __name__ == "__main__":
    key = jax.random.PRNGKey(0)
    kx, kp = jax.random.split(key)

    # Small shapes consistent with the module: N=2, C_in=10, H=W=16
    x = jax.random.normal(kx, (2, 10, 16, 16), jnp.float32)
    params = init_params(kp)

    out = jax.block_until_ready(fused_model_forward(x, params))
    ref = jax.block_until_ready(reference_forward(x, params))

    assert out.shape == (2, 200, 16, 16), out.shape
    # Tolerance accounts for the trace-time weight fold and the EUP approximate
    # reciprocal in the softmax denominator.
    assert jnp.allclose(out, ref, atol=2e-3, rtol=2e-3), "mismatch vs reference"
    # softmax rows sum to 1 over the channel axis
    assert jnp.allclose(jnp.sum(out, axis=1), 1.0, atol=5e-3)

    print("KERNEL_OK")
</pallas_src>

<mosaic_0001>
module attributes {stable_mosaic.version = 11 : i64} {
  func.func @_fused_1x1_softmax_kernel(%arg0: i32, %arg1: i32, %arg2: memref<1x10x256xf32, #tpu.memory_space<vmem>>, %arg3: memref<8x10xf32, #tpu.memory_space<vmem>>, %arg4: memref<8x1xf32, #tpu.memory_space<vmem>>, %arg5: memref<200x8xf32, #tpu.memory_space<vmem>>, %arg6: memref<200x1xf32, #tpu.memory_space<vmem>>, %arg7: memref<1x200x256xf32, #tpu.memory_space<vmem>>) attributes {dimension_semantics = [#tpu.dimension_semantics<parallel>, #tpu.dimension_semantics<parallel>], iteration_bounds = array<i64: 2, 1>, scalar_prefetch = 0 : i64, scratch_operands = 0 : i64, tpu.core_type = #tpu.core_type<tc>, window_params = [{transform_indices = @transform_0, window_bounds = array<i64: 1, 10, 256>}, {pipeline_mode = #tpu.pipeline_mode<synchronous>, transform_indices = @transform_1, window_bounds = array<i64: 8, 10>}, {pipeline_mode = #tpu.pipeline_mode<synchronous>, transform_indices = @transform_2, window_bounds = array<i64: 8, 1>}, {pipeline_mode = #tpu.pipeline_mode<synchronous>, transform_indices = @transform_3, window_bounds = array<i64: 200, 8>}, {pipeline_mode = #tpu.pipeline_mode<synchronous>, transform_indices = @transform_4, window_bounds = array<i64: 200, 1>}, {transform_indices = @transform_5, window_bounds = array<i64: 1, 200, 256>}]} {
    %c0 = arith.constant 0 : index
    %c0_0 = arith.constant 0 : index
    %c0_1 = arith.constant 0 : index
    %0 = vector.load %arg2[%c0, %c0_0, %c0_1] : memref<1x10x256xf32, #tpu.memory_space<vmem>>, vector<1x10x256xf32>
    %1 = vector.shape_cast %0 : vector<1x10x256xf32> to vector<10x256xf32>
    %c0_2 = arith.constant 0 : index
    %c0_3 = arith.constant 0 : index
    %2 = vector.load %arg3[%c0_2, %c0_3] : memref<8x10xf32, #tpu.memory_space<vmem>>, vector<8x10xf32>
    %cst = arith.constant dense<0.000000e+00> : vector<8x256xf32>
    %3 = tpu.matmul %2, %1, %cst {dimension_numbers = #tpu.dot_dimension_numbers<[1], [0], [0], [1], [0, 0, 1, 1], [], []>} : vector<8x10xf32>, vector<10x256xf32>, vector<8x256xf32> -> vector<8x256xf32>
    %c0_4 = arith.constant 0 : index
    %c0_5 = arith.constant 0 : index
    %4 = vector.load %arg4[%c0_4, %c0_5] : memref<8x1xf32, #tpu.memory_space<vmem>>, vector<8x1xf32>
    %5 = vector.broadcast %4 : vector<8x1xf32> to vector<8x256xf32>
    %6 = arith.addf %3, %5 : vector<8x256xf32>
    %cst_6 = arith.constant 0.000000e+00 : f32
    %7 = vector.broadcast %cst_6 : f32 to vector<8x256xf32>
    %8 = arith.maximumf %6, %7 : vector<8x256xf32>
    %c0_7 = arith.constant 0 : index
    %c0_8 = arith.constant 0 : index
    %9 = vector.load %arg5[%c0_7, %c0_8] : memref<200x8xf32, #tpu.memory_space<vmem>>, vector<200x8xf32>
    %cst_9 = arith.constant dense<0.000000e+00> : vector<200x256xf32>
    %10 = tpu.matmul %9, %8, %cst_9 {dimension_numbers = #tpu.dot_dimension_numbers<[1], [0], [0], [1], [0, 0, 1, 1], [], []>} : vector<200x8xf32>, vector<8x256xf32>, vector<200x256xf32> -> vector<200x256xf32>
    %c0_10 = arith.constant 0 : index
    %c0_11 = arith.constant 0 : index
    %11 = vector.load %arg6[%c0_10, %c0_11] : memref<200x1xf32, #tpu.memory_space<vmem>>, vector<200x1xf32>
    %12 = vector.broadcast %11 : vector<200x1xf32> to vector<200x256xf32>
    %13 = arith.addf %10, %12 : vector<200x256xf32>
    %cst_12 = arith.constant dense<0xFF800000> : vector<256xf32>
    %14 = vector.multi_reduction <maximumf>, %13, %cst_12 [0] : vector<200x256xf32> to vector<256xf32>
    %15 = vector.shape_cast %14 : vector<256xf32> to vector<1x256xf32>
    %16 = vector.broadcast %15 : vector<1x256xf32> to vector<200x256xf32>
    %17 = arith.subf %13, %16 : vector<200x256xf32>
    %18 = math.exp %17 : vector<200x256xf32>
    %cst_13 = arith.constant dense<0.000000e+00> : vector<256xf32>
    %19 = vector.multi_reduction <add>, %18, %cst_13 [0] : vector<200x256xf32> to vector<256xf32>
    %20 = vector.shape_cast %19 : vector<256xf32> to vector<1x256xf32>
    %21 = tpu.reciprocal %20 {approx = true} : vector<1x256xf32> -> vector<1x256xf32>
    %22 = vector.broadcast %21 : vector<1x256xf32> to vector<200x256xf32>
    %23 = arith.mulf %18, %22 : vector<200x256xf32>
    %c0_14 = arith.constant 0 : index
    %c0_15 = arith.constant 0 : index
    %c0_16 = arith.constant 0 : index
    %24 = vector.load %arg7[%c0_14, %c0_15, %c0_16] : memref<1x200x256xf32, #tpu.memory_space<vmem>>, vector<1x200x256xf32>
    %25 = vector.shape_cast %24 : vector<1x200x256xf32> to vector<200x256xf32>
    %26 = vector.shape_cast %23 : vector<200x256xf32> to vector<1x200x256xf32>
    tpu.vector_store %arg7[%c0_14, %c0_15, %c0_16], %26 {strides = array<i32>} : memref<1x200x256xf32, #tpu.memory_space<vmem>>, vector<1x200x256xf32>,
    return
  }
  func.func @transform_0(%arg0: i32, %arg1: i32) -> (i32, i32, i32) {
    %c0_i32 = arith.constant 0 : i32
    %c0_i32_0 = arith.constant 0 : i32
    return %arg0, %c0_i32, %arg1 : i32, i32, i32
  }
  func.func @transform_1(%arg0: i32, %arg1: i32) -> (i32, i32) {
    %c0_i32 = arith.constant 0 : i32
    %c0_i32_0 = arith.constant 0 : i32
    %c0_i32_1 = arith.constant 0 : i32
    return %c0_i32, %c0_i32_0 : i32, i32
  }
  func.func @transform_2(%arg0: i32, %arg1: i32) -> (i32, i32) {
    %c0_i32 = arith.constant 0 : i32
    %c0_i32_0 = arith.constant 0 : i32
    %c0_i32_1 = arith.constant 0 : i32
    return %c0_i32, %c0_i32_0 : i32, i32
  }
  func.func @transform_3(%arg0: i32, %arg1: i32) -> (i32, i32) {
    %c0_i32 = arith.constant 0 : i32
    %c0_i32_0 = arith.constant 0 : i32
    %c0_i32_1 = arith.constant 0 : i32
    return %c0_i32, %c0_i32_0 : i32, i32
  }
  func.func @transform_4(%arg0: i32, %arg1: i32) -> (i32, i32) {
    %c0_i32 = arith.constant 0 : i32
    %c0_i32_0 = arith.constant 0 : i32
    %c0_i32_1 = arith.constant 0 : i32
    return %c0_i32, %c0_i32_0 : i32, i32
  }
  func.func @transform_5(%arg0: i32, %arg1: i32) -> (i32, i32, i32) {
    %c0_i32 = arith.constant 0 : i32
    %c0_i32_0 = arith.constant 0 : i32
    return %arg0, %c0_i32, %arg1 : i32, i32, i32
  }
}

</mosaic_0001>

<bundles_post_ra>
// kernel: tpu_custom_call.1
= control target key start
LH: loop header
LB: loop body
LE: loop exit
PB: predicated region body
PF: predicated region fallthrough
CT: control target
= control target key end

     0   :  { %10 = vsyncpa [#allocation3], 0  ;;  %s2468_s0 = inlined_call_operand.vmem [shape: f32[2,10,256], index: 0, kind: input, shape index: {}]   ;;  %s2469_s1 = inlined_call_operand.vmem [shape: f32[8,10], index: 1, kind: input, shape index: {}]   ;;  %s2470_s2 = inlined_call_operand.vmem [shape: f32[8,1], index: 2, kind: input, shape index: {}]   ;;  %s2471_s3 = inlined_call_operand.vmem [shape: f32[200,8], index: 3, kind: input, shape index: {}]   ;;  %s2472_s4 = inlined_call_operand.vmem [shape: f32[200,1], index: 4, kind: input, shape index: {}]   ;;  %s2473_s5 = inlined_call_operand.hbm [shape: f32[2,200,256], index: 5, kind: output, shape index: {}]  }
   0x1   :  { %12 = vsyncpa [#allocation3 + $0x1], 0  ;;  %s1569_s18 = smov 0   ;;  %s1571_s19 = smov 0  }
   0x2   :  { %s1573_s20 = smov 0   ;;  %s1575_s21 = smov 0  }
   0x3   :  { %s1577_s22 = smov 0   ;;  %s1579_s23 = smov 0  }
   0x4 LB: > { %s1222_s24 = sadd.s32 4294967295, %s1534_s23   ;;  %s1223_s25 = sadd.s32 4294967294, %s1534_s23   ;;  %s1534_s23 = sphi %s1579_s23, %s18_s23   ;;  %s1530_s22 = sphi %s1577_s22, %s2498_s22   ;;  %s1526_s21 = sphi %s1575_s21, %s2497_s21   ;;  %s1522_s20 = sphi %s1573_s20, %s2496_s20   ;;  %s1518_s19 = sphi %s1571_s19, %s2495_s19   ;;  %s1514_s18 = sphi %s1569_s18, %s2494_s18  }
   0x5   : > { %s30_s26 = sadd.s32 1, %s1530_s22  ;;  %s151_s27 = sadd.s32 1, %s1522_s20 }
   0x6   : > { %p32_p0 = scmp.ge.s32.totalorder %s30_s26, 2  ;;  %p161_p1 = scmp.ne.s32.totalorder %s1522_s20, %s1518_s19 }
   0x7   : > { %p162_p2 = scmp.eq.s32.totalorder %s1222_s24, 1  ;;  %p167_p3 = scmp.ne.s32.totalorder %s1518_s19, %s1514_s18 }
   0x8   : > { %s2500_s26 = smov (%p32_p0, %s30_s26), 0  ;;  %p168_p5 = scmp.eq.s32.totalorder %s1223_s25, 1 }
   0x9   : > { %p1609_p4 = por %p162_p2, %p161_p1  ;;  %s146_s29 = ssub.s32 %s1530_s22, %s2500_s26 }
   0xa   : > { %p1226_p6 = scmp.ge.s32.totalorder %s1534_s23, 1  ;;  %p149_p7 = scmp.eq.s32.totalorder %s146_s29, 0 }
   0xb   : > { %p1616_p8 = por %p168_p5, %p167_p3  ;;  %p211_p9 = scmp.lt.s32.totalorder %s1534_s23, 3 }
   0xc   : > { %s1622_s6 = scalar_select %p149_p7, %s1522_s20, %s151_s27  }
   0xd   : > { %p212_p10 = pnand %p1226_p6, %p211_p9 }
   0xf   : > { %215 = sbr.rel (%p212_p10) target bundleno = 556 (0x22c), region = 40 }
  0x14   : > { %v259_v0 = vld [vmem:[%s2470_s2] sm:$0xff]  ;;  %p244_p11 = scmp.lt.s32.totalorder %s1526_s21, 1  ;;  %v1536_v1 = vmov 0   ;;  %vm269_vm0 = vcmask 1041408   ;;  %vm265_vm1 = vcmask 80896   ;;  %v348_v8 = vld [vmem:[%s2472_s4 + $0x28] sm:$0xff] }
  0x15   : > { %1349 = vset.pattern.permute.xlu0 %v1536_v1  ;;  %1350 = vset.pattern.permute.xlu1 %v1536_v1  ;;  %v343_v6 = vld [vmem:[%s2472_s4] sm:$0xff]  ;;  %v354_v10 = vld [vmem:[%s2472_s4 + $0x58] sm:$0xff]  ;;  %v357_v11 = vld [vmem:[%s2472_s4 + $0x70] sm:$0xff]  ;;  %vm493_vm2 = vcmask 64512   ;;  %s240_s11 = sand.u32 1, %s1518_s19   ;;  %s1290_s14 = smul.u32 400, %s1526_s21 }
  0x16   : > { %262 = vperm.xlu0 %1349, %v259_v0   ;;  %s245_s9 = scalar_select %p244_p11, %s1526_s21, 1  ;;  %1351 = vset.pattern.permute.xlu2 %v1536_v1  ;;  %v258_v7 = vld [vmem:[%s2469_s1] sm:$0xff]  ;;  %v360_v12 = vld [vmem:[%s2472_s4 + $0x88] sm:$0xff]  ;;  %v366_v14 = vld [vmem:[%s2472_s4 + $0xb8] sm:$0xff] }
  0x17   : > { %v351_v9 = vld [vmem:[%s2472_s4 + $0x40] sm:$0xff]  ;;  %v345_v15 = vld [vmem:[%s2472_s4 + $0x10] sm:$0xff]  ;;  %v344_v16 = vld [vmem:[%s2472_s4 + $0x8] sm:$0xff]  ;;  %s1289_s12 = smul.u32 400, %s240_s11  ;;  %s1139_s17 = scalar_lea.hbm %s2473_s5, %s1290_s14 }
  0x18   : > { %s1286_s10 = sshll.u32 %s245_s9, 5  ;;  %v363_v13 = vld [vmem:[%s2472_s4 + $0xa0] sm:$0xff]  ;;  %380 = vperm.xlu1 %1350, %v345_v15   ;;  %v349_v17 = vld [vmem:[%s2472_s4 + $0x30] sm:$0xff]  ;;  %v352_v18 = vld [vmem:[%s2472_s4 + $0x48] sm:$0xff]  ;;  %s1142_s25 = sshll.u32 %s1139_s17, 4  ;;  %s1143_s25 = int_to_ptr.hbm [resolvable:$true] %s1142_s25 }
  0x19   : > { %s251_s13 = scalar_lea.vmem %s2468_s0, %s1286_s10  ;;  %v346_v21 = vld [vmem:[%s2472_s4 + $0x18] sm:$0xff]  ;;  %v355_v22 = vld [vmem:[%s2472_s4 + $0x60] sm:$0xff]  ;;  %v319_v32 = vld [vmem:[%s2471_s3 + $0x8] sm:$0xff]  ;;  %s1126_s21 = scalar_lea.sflag [#allocation3], %s240_s11 }
  0x1a   : > { %v256_v2 = vld [vmem:[%s251_s13 + $0x10] sm:$0x3]  ;;  %v257_v3 = vld [vmem:[%s251_s13 + $0x18] sm:$0x3]  ;;  %v254_v4 = vld [vmem:[%s251_s13] sm:$0xff]  ;;  %385 = vperm.xlu2 %1351, %v346_v21   ;;  %s1470_s27 = sshra.s32 %s1143_s25, 4  ;;  %s1471_s27 = int_to_ptr.hbm [resolvable:$true] %s1470_s27 }
  0x1b   : > { %1229 = vmatpush.msk.msra.mxu0 %vm269_vm0, %v256_v2  ;;  %1231 = vmatpush.msk.msra.mxu1 %vm269_vm0, %v257_v3  ;;  %v255_v5 = vld [vmem:[%s251_s13 + $0x8] sm:$0xff]  ;;  %v318_v28 = vld [vmem:[%s2471_s3] sm:$0xff]  ;;  %v329_v29 = vld [vmem:[%s2471_s3 + $0x58] sm:$0xff]  ;;  %s2330_s13 = scalar_lea.vmem [#allocation2], %s1289_s12  ;;  %s1472_s29 = scalar_lea.hbm %s1471_s27, 400 }
  0x1c   : > { %v347_v30 = vld [vmem:[%s2472_s4 + $0x20] sm:$0xff]  ;;  %v358_v31 = vld [vmem:[%s2472_s4 + $0x78] sm:$0xff]  ;;  %v361_v35 = vld [vmem:[%s2472_s4 + $0x90] sm:$0xff]  ;;  %s1140_s24 = sshll.u32 %s2330_s13, 4  ;;  %p1473_p12 = scmp.ne.s32.totalorder %s1471_s27, %s1472_s29  ;;  %s1141_s24 = int_to_ptr.vmem [resolvable:$true] %s1140_s24 }
  0x1d   : > { %291 = vmatpush.msra.mxu0 %v254_v4  ;;  %311 = vmatpush.msra.mxu1 %v255_v5  ;;  %v330_v33 = vld [vmem:[%s2471_s3 + $0x60] sm:$0xff]  ;;  %v350_v34 = vld [vmem:[%s2472_s4 + $0x38] sm:$0xff]  ;;  %v320_v36 = vld [vmem:[%s2471_s3 + $0x10] sm:$0xff]  ;;  %s1476_s9 = scalar_lea.hbm %s2473_s5, 800  ;;  %p1477_p1 = scmp.lt.s32.totalorder %s1471_s27, %s2473_s5 }
  0x1e   : > { %370 = vperm.xlu0 %1349, %v343_v6   ;;  %1230 = vmatmul.msk.f32.vlgmr.msra.gmra.mxu0 %vm265_vm1, %v258_v7  ;;  %v331_v37 = vld [vmem:[%s2471_s3 + $0x68] sm:$0xff]  ;;  %v353_v38 = vld [vmem:[%s2472_s4 + $0x50] sm:$0xff]  ;;  %v321_v40 = vld [vmem:[%s2471_s3 + $0x18] sm:$0xff]  ;;  %p1474_p13 = pnand %p1473_p12, %p1609_p4  ;;  %p1478_p2 = scmp.lt.s32.totalorder %s1476_s9, %s1472_s29 }
  0x1f   : > { %1232 = vmatmul.msk.f32.vlgmr.msra.gmra.mxu1 %vm265_vm1, %v258_v7  ;;  %v364_v39 = vld [vmem:[%s2472_s4 + $0xa8] sm:$0xff]  ;;  %v332_v41 = vld [vmem:[%s2471_s3 + $0x70] sm:$0xff]  ;;  %v367_v43 = vld [vmem:[%s2472_s4 + $0xc0] sm:$0xff] }
  0x20   : > { %375 = vperm.xlu1 %1350, %v344_v16   ;;  %v356_v42 = vld [vmem:[%s2472_s4 + $0x68] sm:$0xff]  ;;  %v322_v44 = vld [vmem:[%s2471_s3 + $0x20] sm:$0xff]  ;;  %v333_v45 = vld [vmem:[%s2471_s3 + $0x78] sm:$0xff]  ;;  %p1475_p0 = pneg %p1474_p13  ;;  %p1479_p3 = por %p1478_p2, %p1477_p1 }
  0x21   : > { %v359_v46 = vld [vmem:[%s2472_s4 + $0x80] sm:$0xff]  ;;  %v323_v47 = vld [vmem:[%s2471_s3 + $0x28] sm:$0xff]  ;;  %v362_v49 = vld [vmem:[%s2472_s4 + $0x98] sm:$0xff] }
  0x22   : > { %390 = vperm.xlu2 %1351, %v347_v30   ;;  %v334_v48 = vld [vmem:[%s2471_s3 + $0x80] sm:$0xff]  ;;  %v324_v50 = vld [vmem:[%s2471_s3 + $0x30] sm:$0xff]  ;;  %v335_v51 = vld [vmem:[%s2471_s3 + $0x88] sm:$0xff]  ;;  %p1480_p5 = pnand %p1479_p3, %p1475_p0 }
  0x23   : > { %v365_v52 = vld [vmem:[%s2472_s4 + $0xb0] sm:$0xff]  ;;  %v325_v53 = vld [vmem:[%s2471_s3 + $0x38] sm:$0xff]  ;;  %v326_v55 = vld [vmem:[%s2471_s3 + $0x40] sm:$0xff] }
  0x24   : > { %v336_v54 = vld [vmem:[%s2471_s3 + $0x90] sm:$0xff]  ;;  %v337_v56 = vld [vmem:[%s2471_s3 + $0x98] sm:$0xff]  ;;  %v327_v57 = vld [vmem:[%s2471_s3 + $0x48] sm:$0xff] }
  0x25   : > { %v338_v58 = vld [vmem:[%s2471_s3 + $0xa0] sm:$0xff]  ;;  %v328_v59 = vld [vmem:[%s2471_s3 + $0x50] sm:$0xff]  ;;  %v339_v60 = vld [vmem:[%s2471_s3 + $0xa8] sm:$0xff] }
  0x26   : > { %395 = vperm.xlu0 %1349, %v348_v8   ;;  %v340_v61 = vld [vmem:[%s2471_s3 + $0xb0] sm:$0xff]  ;;  %v341_v62 = vld [vmem:[%s2471_s3 + $0xb8] sm:$0xff]  ;;  %v342_v63 = vld [vmem:[%s2471_s3 + $0xc0] sm:$0xff] }
  0x28   : > { %400 = vperm.xlu1 %1350, %v349_v17  }
  0x2a   : > { %405 = vperm.xlu2 %1351, %v350_v34  }
  0x2e   : > { %410 = vperm.xlu0 %1349, %v351_v9  }
  0x30   : > { %415 = vperm.xlu1 %1350, %v352_v18  }
  0x32   : > { %420 = vperm.xlu2 %1351, %v353_v38  }
  0x36   : > { %425 = vperm.xlu0 %1349, %v354_v10  }
  0x38   : > { %430 = vperm.xlu1 %1350, %v355_v22  }
  0x3a   : > { %435 = vperm.xlu2 %1351, %v356_v42  }
  0x3e   : > { %440 = vperm.xlu0 %1349, %v357_v11  }
  0x40   : > { %445 = vperm.xlu1 %1350, %v358_v31  }
  0x42   : > { %450 = vperm.xlu2 %1351, %v359_v46  }
  0x46   : > { %455 = vperm.xlu0 %1349, %v360_v12  }
  0x48   : > { %460 = vperm.xlu1 %1350, %v361_v35  }
  0x4a   : > { %465 = vperm.xlu2 %1351, %v362_v49  }
  0x4e   : > { %470 = vperm.xlu0 %1349, %v363_v13  }
  0x50   : > { %475 = vperm.xlu1 %1350, %v364_v39  }
  0x52   : > { %480 = vperm.xlu2 %1351, %v365_v52  }
  0x56   : > { %485 = vperm.xlu0 %1349, %v366_v14  }
  0x58   : > { %490 = vperm.xlu1 %1350, %v367_v43  }
  0x88   : > { %v263_v19 = vpop.permute.xlu0 %262 }
  0x8a   : > { %v381_v0 = vpop.permute.xlu1 %380 }
  0x90   : > { %v1837_v2 = vpop.permute.xlu0 %370 }
  0x92   : > { %v376_v8 = vpop.permute.xlu1 %375 }
  0x98   : > { %v396_v34 = vpop.permute.xlu0 %395 }
  0x9b   : > { %v293_v20 = vpop.f32.mrf.mxu0 }
  0x9c   : > { %v294_v23 = vadd.f32 %v293_v20, %v263_v19  ;;  %v313_v24 = vpop.f32.mrf.mxu1  ;;  %v386_v20 = vpop.permute.xlu2 %385 }
  0x9d   : > { %v314_v25 = vadd.f32 %v313_v24, %v263_v19 }
  0x9e   : > { %v316_v26 = vmax.f32 %v294_v23, 0.0 }
  0x9f   : > { %v317_v27 = vmax.f32 %v314_v25, 0.0 }
  0xa0   : > { %584 = vmatpush.msrb.mxu0 %v316_v26  ;;  %1287 = vmatpush.msra.mxu2 %v316_v26  ;;  %v411_v43 = vpop.permute.xlu0 %410 }
  0xa1   : > { %676 = vmatpush.msrb.mxu1 %v317_v27  ;;  %1288 = vmatpush.msra.mxu3 %v317_v27 }
  0xa2   : > { %1233 = vmatmul.msk.f32.vlgmr.msrb.gmra.mxu0 %vm493_vm2, %v318_v28  ;;  %1244 = vmatmul.msk.f32.vlgmr.msra.gmra.mxu2 %vm493_vm2, %v329_v29 }
  0xa3   : > { %1258 = vmatmul.msk.f32.vlgmr.msrb.gmra.mxu1 %vm493_vm2, %v318_v28  ;;  %1269 = vmatmul.msk.f32.vlgmr.msra.gmra.mxu3 %vm493_vm2, %v329_v29 }
  0xaa   : > { %1234 = vmatmul.msk.f32.gmra.mxu0 %vm493_vm2, %v319_v32  ;;  %1245 = vmatmul.msk.f32.gmra.mxu2 %vm493_vm2, %v330_v33 }
  0xab   : > { %1259 = vmatmul.msk.f32.gmra.mxu1 %vm493_vm2, %v319_v32  ;;  %1270 = vmatmul.msk.f32.gmra.mxu3 %vm493_vm2, %v330_v33  ;;  %v391_v32 = vpop.permute.xlu2 %390 }
  0xb2   : > { %1235 = vmatmul.msk.f32.gmra.mxu0 %vm493_vm2, %v320_v36  ;;  %1246 = vmatmul.msk.f32.gmra.mxu2 %vm493_vm2, %v331_v37 }
  0xb3   : > { %1260 = vmatmul.msk.f32.gmra.mxu1 %vm493_vm2, %v320_v36  ;;  %1271 = vmatmul.msk.f32.gmra.mxu3 %vm493_vm2, %v331_v37  ;;  %v401_v36 = vpop.permute.xlu1 %400  ;;  %v406_v39 = vpop.permute.xlu2 %405 }
  0xba   : > { %1236 = vmatmul.msk.f32.gmra.mxu0 %vm493_vm2, %v321_v40  ;;  %1247 = vmatmul.msk.f32.gmra.mxu2 %vm493_vm2, %v332_v41 }
  0xbb   : > { %1261 = vmatmul.msk.f32.gmra.mxu1 %vm493_vm2, %v321_v40  ;;  %1272 = vmatmul.msk.f32.gmra.mxu3 %vm493_vm2, %v332_v41 }
  0xc2   : > { %1237 = vmatmul.msk.f32.gmra.mxu0 %vm493_vm2, %v322_v44  ;;  %1248 = vmatmul.msk.f32.gmra.mxu2 %vm493_vm2, %v333_v45 }
  0xc3   : > { %1262 = vmatmul.msk.f32.gmra.mxu1 %vm493_vm2, %v322_v44  ;;  %1273 = vmatmul.msk.f32.gmra.mxu3 %vm493_vm2, %v333_v45  ;;  %v416_v45 = vpop.permute.xlu1 %415 }
  0xca   : > { %1238 = vmatmul.msk.f32.gmra.mxu0 %vm493_vm2, %v323_v47  ;;  %1249 = vmatmul.msk.f32.gmra.mxu2 %vm493_vm2, %v334_v48 }
  0xcb   : > { %1263 = vmatmul.msk.f32.gmra.mxu1 %vm493_vm2, %v323_v47  ;;  %1274 = vmatmul.msk.f32.gmra.mxu3 %vm493_vm2, %v334_v48  ;;  %v421_v48 = vpop.permute.xlu2 %420 }
  0xd2   : > { %1239 = vmatmul.msk.f32.gmra.mxu0 %vm493_vm2, %v324_v50  ;;  %1250 = vmatmul.msk.f32.gmra.mxu2 %vm493_vm2, %v335_v51 }
  0xd3   : > { %1264 = vmatmul.msk.f32.gmra.mxu1 %vm493_vm2, %v324_v50  ;;  %1275 = vmatmul.msk.f32.gmra.mxu3 %vm493_vm2, %v335_v51 }
  0xda   : > { %1240 = vmatmul.msk.f32.gmra.mxu0 %vm493_vm2, %v325_v53  ;;  %1251 = vmatmul.msk.f32.gmra.mxu2 %vm493_vm2, %v336_v54 }
  0xdb   : > { %1265 = vmatmul.msk.f32.gmra.mxu1 %vm493_vm2, %v325_v53  ;;  %1276 = vmatmul.msk.f32.gmra.mxu3 %vm493_vm2, %v336_v54  ;;  %v426_v53 = vpop.permute.xlu0 %425 }
  0xe2   : > { %1241 = vmatmul.msk.f32.gmra.mxu0 %vm493_vm2, %v326_v55  ;;  %1252 = vmatmul.msk.f32.gmra.mxu2 %vm493_vm2, %v337_v56 }
  0xe3   : > { %1266 = vmatmul.msk.f32.gmra.mxu1 %vm493_vm2, %v326_v55  ;;  %1277 = vmatmul.msk.f32.gmra.mxu3 %vm493_vm2, %v337_v56  ;;  %v431_v55 = vpop.permute.xlu1 %430 }
  0xea   : > { %1242 = vmatmul.msk.f32.gmra.mxu0 %vm493_vm2, %v327_v57  ;;  %1253 = vmatmul.msk.f32.gmra.mxu2 %vm493_vm2, %v338_v58 }
  0xeb   : > { %1267 = vmatmul.msk.f32.gmra.mxu1 %vm493_vm2, %v327_v57  ;;  %1278 = vmatmul.msk.f32.gmra.mxu3 %vm493_vm2, %v338_v58 }
  0xf2   : > { %1243 = vmatmul.msk.f32.gmra.mxu0 %vm493_vm2, %v328_v59  ;;  %1254 = vmatmul.msk.f32.gmra.mxu2 %vm493_vm2, %v339_v60 }
  0xf3   : > { %1268 = vmatmul.msk.f32.gmra.mxu1 %vm493_vm2, %v328_v59  ;;  %1279 = vmatmul.msk.f32.gmra.mxu3 %vm493_vm2, %v339_v60 }
  0xfa   : > { %1255 = vmatmul.msk.f32.gmra.mxu2 %vm493_vm2, %v340_v61 }
  0xfb   : > { %1280 = vmatmul.msk.f32.gmra.mxu3 %vm493_vm2, %v340_v61 }
 0x102   : > { %1256 = vmatmul.msk.f32.gmra.mxu2 %vm493_vm2, %v341_v62 }
 0x103   : > { %1281 = vmatmul.msk.f32.gmra.mxu3 %vm493_vm2, %v341_v62 }
 0x10a   : > { %1257 = vmatmul.msk.f32.gmra.mxu2 %vm493_vm2, %v342_v63 }
 0x10b   : > { %1282 = vmatmul.msk.f32.gmra.mxu3 %vm493_vm2, %v342_v63 }
 0x11f   : > { %v1835_v1 = vpop.f32.mrf.mxu0 }
 0x120   : > { %v678_v3 = vpop.f32.mrf.mxu1 }
 0x121   : > { %v1840_v4 = vadd.f32 %v678_v3, %v1837_v2 }
 0x125   : > { %v1842_v5 = vpop.f32.mrf.mxu2 }
 0x126   : > { %v1844_v6 = vpop.f32.mrf.mxu3 }
 0x127   : > { %v589_v7 = vpop.f32.mrf.mxu0 }
 0x128   : > { %v681_v9 = vpop.f32.mrf.mxu1  ;;  %v1884_v50 = vadd.f32 %v589_v7, %v376_v8 }
 0x129   : > { %v1846_v10 = vadd.f32 %v681_v9, %v376_v8  ;;  %v1908_v8 = vadd.f32 %v1835_v1, %v1837_v2 }
 0x12d   : > { %v1848_v11 = vpop.f32.mrf.mxu2 }
 0x12e   : > { %v1850_v12 = vpop.f32.mrf.mxu3 }
 0x12f   : > { %v592_v13 = vpop.f32.mrf.mxu0 }
 0x130   : > { %v684_v14 = vpop.f32.mrf.mxu1  ;;  %v1900_v61 = vadd.f32 %v592_v13, %v381_v0 }
 0x131   : > { %v1852_v15 = vadd.f32 %v684_v14, %v381_v0  ;;  %v436_v0 = vpop.permute.xlu2 %435 }
 0x132   : > { %v753_v1 = vmax.f32 %v1908_v8, %v1900_v61 }
 0x133   : > { %v783_v16 = vmax.f32 %v1840_v4, %v1852_v15 }
 0x135   : > { %v1856_v17 = vpop.f32.mrf.mxu2 }
 0x136   : > { %v1858_v18 = vpop.f32.mrf.mxu3 }
 0x137   : > { %v595_v19 = vpop.f32.mrf.mxu0 }
 0x138   : > { %v687_v21 = vpop.f32.mrf.mxu1  ;;  %v1886_v51 = vadd.f32 %v595_v19, %v386_v20 }
 0x139   : > { %v1860_v22 = vadd.f32 %v687_v21, %v386_v20 }
 0x13a   : > { %v754_v57 = vmax.f32 %v1884_v50, %v1886_v51 }
 0x13b   : > { %v784_v23 = vmax.f32 %v1846_v10, %v1860_v22 }
 0x13d   : > { %v1864_v24 = vpop.f32.mrf.mxu2 }
 0x13e   : > { %v1866_v25 = vpop.f32.mrf.mxu3 }
 0x13f   : > { %v598_v26 = vpop.f32.mrf.mxu0 }
 0x140   : > { %v690_v27 = vpop.f32.mrf.mxu1  ;;  %v1910_v9 = vadd.f32 %v598_v26, %v391_v32 }
 0x141   : > { %v1915_v13 = vadd.f32 %v690_v27, %v391_v32  ;;  %v441_v32 = vpop.permute.xlu0 %440 }
 0x145   : > { %v1868_v28 = vpop.f32.mrf.mxu2 }
 0x146   : > { %v1870_v29 = vpop.f32.mrf.mxu3 }
 0x147   : > { %v601_v30 = vpop.f32.mrf.mxu0 }
 0x148   : > { %v693_v31 = vpop.f32.mrf.mxu1  ;;  %v1888_v54 = vadd.f32 %v601_v30, %v396_v34 }
 0x149   : > { %v1890_v56 = vadd.f32 %v693_v31, %v396_v34  ;;  %v1929_v31 = vadd.f32 %v1844_v6, %v426_v53  ;;  %v785_v6 = vmax.f32 %v783_v16, %v1915_v13 }
 0x14a   : > { %v756_v62 = vmax.f32 %v754_v57, %v1888_v54 }
 0x14b   : > { %v786_v3 = vmax.f32 %v784_v23, %v1890_v56  ;;  %v1921_v23 = vadd.f32 %v1842_v5, %v426_v53  ;;  %v755_v5 = vmax.f32 %v753_v1, %v1910_v9 }
 0x14d   : > { %v1872_v33 = vpop.f32.mrf.mxu2 }
 0x14e   : > { %v1874_v35 = vpop.f32.mrf.mxu3 }
 0x14f   : > { %v604_v37 = vpop.f32.mrf.mxu0 }
 0x150   : > { %v696_v38 = vpop.f32.mrf.mxu1  ;;  %v1925_v2 = vadd.f32 %v604_v37, %v401_v36 }
 0x151   : > { %v1931_v34 = vadd.f32 %v696_v38, %v401_v36 }
 0x155   : > { %v1876_v40 = vpop.f32.mrf.mxu2 }
 0x156   : > { %v1878_v41 = vpop.f32.mrf.mxu3 }
 0x157   : > { %v607_v42 = vpop.f32.mrf.mxu0 }
 0x158   : > { %v699_v44 = vpop.f32.mrf.mxu1  ;;  %v1894_v58 = vadd.f32 %v607_v42, %v406_v39 }
 0x159   : > { %v1896_v59 = vadd.f32 %v699_v44, %v406_v39  ;;  %v1935_v39 = vadd.f32 %v1856_v17, %v436_v0  ;;  %v446_v44 = vpop.permute.xlu1 %445 }
 0x15a   : > { %v758_v14 = vmax.f32 %v756_v62, %v1894_v58  ;;  %v1952_v53 = vadd.f32 %v1868_v28, %v446_v44 }
 0x15b   : > { %v788_v21 = vmax.f32 %v786_v3, %v1896_v59  ;;  %v787_v3 = vmax.f32 %v785_v6, %v1931_v34 }
 0x15d   : > { %v1880_v46 = vpop.f32.mrf.mxu2 }
 0x15e   : > { %v1882_v47 = vpop.f32.mrf.mxu3 }
 0x15f   : > { %v610_v49 = vpop.f32.mrf.mxu0 }
 0x160   : > { %v702_v52 = vpop.f32.mrf.mxu1  ;;  %v1938_v42 = vadd.f32 %v610_v49, %v411_v43  ;;  %v757_v49 = vmax.f32 %v755_v5, %v1925_v2  ;;  %v1978_v5 = vadd.f32 %v1864_v24, %v441_v32 }
 0x161   : > { %v1948_v36 = vadd.f32 %v702_v52, %v411_v43 }
 0x162   : > { %v759_v52 = vmax.f32 %v757_v49, %v1938_v42 }
 0x165   : > { %v1898_v60 = vpop.f32.mrf.mxu2 }
 0x166   : > { %v1903_v63 = vpop.f32.mrf.mxu3 }
 0x167   : > { %v613_v7 = vpop.f32.mrf.mxu0 }
 0x168   : > { %v1913_v19 = vadd.f32 %v613_v7, %v416_v45  ;;  %v705_v20 = vpop.f32.mrf.mxu1 }
 0x169   : > { %v1918_v30 = vadd.f32 %v705_v20, %v416_v45  ;;  %v1942_v45 = vadd.f32 %v1858_v18, %v436_v0  ;;  %v1957_v18 = vadd.f32 %v1870_v29, %v446_v44  ;;  %v789_v20 = vmax.f32 %v787_v3, %v1948_v36  ;;  %v451_v44 = vpop.permute.xlu2 %450 }
 0x16a   : > { %v760_v26 = vmax.f32 %v758_v14, %v1913_v19  ;;  %v1970_v29 = vadd.f32 %v1848_v11, %v431_v55 }
 0x16b   : > { %2482 = vst [vmem:[#allocation5_spill] sm:$0xff] %v1918_v30  ;;  %v790_v27 = vmax.f32 %v788_v21, %v1918_v30 }
 0x16c   : > { %v762_v37 = vmax.f32 %v760_v26, %v1921_v23  ;;  %v1974_v26 = vadd.f32 %v1850_v12, %v431_v55  ;;  %v461_v55 = vpop.permute.xlu1 %460 }
 0x16d   : > { %v792_v17 = vmax.f32 %v790_v27, %v1929_v31  ;;  %v646_v38 = vpop.f32.mrf.mxu2 }
 0x16e   : > { %v764_v57 = vmax.f32 %v762_v37, %v1935_v39  ;;  %v738_v62 = vpop.f32.mrf.mxu3 }
 0x16f   : > { %v794_v16 = vmax.f32 %v792_v17, %v1942_v45  ;;  %v616_v43 = vpop.f32.mrf.mxu0 }
 0x170   : > { %v1962_v7 = vadd.f32 %v616_v43, %v421_v48  ;;  %v708_v14 = vpop.f32.mrf.mxu1  ;;  %v766_v28 = vmax.f32 %v764_v57, %v1952_v53  ;;  %v456_v57 = vpop.permute.xlu0 %455 }
 0x171   : > { %v1966_v0 = vadd.f32 %v708_v14, %v421_v48  ;;  %v796_v21 = vmax.f32 %v794_v16, %v1957_v18  ;;  %v1982_v48 = vadd.f32 %v1866_v25, %v441_v32  ;;  %v466_v24 = vpop.permute.xlu2 %465  ;;  %v1991_v32 = vadd.f32 %v1874_v35, %v451_v44 }
 0x172   : > { %v761_v1 = vmax.f32 %v759_v52, %v1962_v7  ;;  %v1988_v52 = vadd.f32 %v1872_v33, %v451_v44  ;;  %v2005_v33 = vadd.f32 %v1882_v47, %v461_v55 }
 0x173   : > { %2483 = vst [vmem:[#allocation6_spill] sm:$0xff] %v1966_v0  ;;  %v791_v27 = vmax.f32 %v789_v20, %v1966_v0  ;;  %v2002_v0 = vadd.f32 %v1878_v41, %v456_v57 }
 0x174   : > { %v763_v37 = vmax.f32 %v761_v1, %v1970_v29  ;;  %v476_v25 = vpop.permute.xlu1 %475  ;;  %2484 = vst [vmem:[#allocation7_spill] sm:$0xff] %v1991_v32 }
 0x175   : > { %v793_v6 = vmax.f32 %v791_v27, %v1974_v26  ;;  %v649_v11 = vpop.f32.mrf.mxu2  ;;  %v1996_v27 = vadd.f32 %v1876_v40, %v456_v57  ;;  %2485 = vst [vmem:[#allocation8_spill] sm:$0xff] %v2005_v33  ;;  %v2021_v57 = vadd.f32 %v1903_v63, %v466_v24 }
 0x176   : > { %v765_v17 = vmax.f32 %v763_v37, %v1978_v5  ;;  %v741_v49 = vpop.f32.mrf.mxu3  ;;  %v1999_v37 = vadd.f32 %v1880_v46, %v461_v55  ;;  %v2016_v30 = vadd.f32 %v649_v11, %v476_v25 }
 0x177   : > { %v795_v12 = vmax.f32 %v793_v6, %v1982_v48  ;;  %v768_v35 = vmax.f32 %v766_v28, %v1996_v27  ;;  %v2025_v55 = vadd.f32 %v741_v49, %v476_v25 }
 0x178   : > { %v471_v43 = vpop.permute.xlu0 %470  ;;  %v767_v14 = vmax.f32 %v765_v17, %v1988_v52 }
 0x179   : > { %v797_v20 = vmax.f32 %v795_v12, %v1991_v32  ;;  %v481_v17 = vpop.permute.xlu2 %480  ;;  %v798_v12 = vmax.f32 %v796_v21, %v2002_v0  ;;  %v2012_v32 = vadd.f32 %v1898_v60, %v466_v24  ;;  %v2014_v46 = vadd.f32 %v646_v38, %v471_v43  ;;  %2487 = vst [vmem:[#allocation10_spill] sm:$0xff] %v2025_v55 }
 0x17a   : > { %v769_v44 = vmax.f32 %v767_v14, %v1999_v37  ;;  %v2023_v28 = vadd.f32 %v738_v62, %v471_v43 }
 0x17b   : > { %v799_v40 = vmax.f32 %v797_v20, %v2005_v33  ;;  %v770_v14 = vmax.f32 %v768_v35, %v2012_v32 }
 0x17c   : > { %2486 = vst [vmem:[#allocation9_spill] sm:$0xff] %v2023_v28  ;;  %v771_v60 = vmax.f32 %v769_v44, %v2014_v46  ;;  %v491_v11 = vpop.permute.xlu1 %490 }
 0x17d   : > { %v652_v3 = vpop.f32.mrf.mxu2  ;;  %v801_v20 = vmax.f32 %v799_v40, %v2023_v28  ;;  %v772_v62 = vmax.f32 %v770_v14, %v2016_v30 }
 0x17e   : > { %v744_v16 = vpop.f32.mrf.mxu3  ;;  %v2018_v41 = vadd.f32 %v652_v3, %v481_v17  ;;  %v800_v3 = vmax.f32 %v798_v12, %v2021_v57 }
 0x17f   : > { %v2027_v21 = vadd.f32 %v744_v16, %v481_v17 }
 0x180   : > { %v486_v47 = vpop.permute.xlu0 %485  ;;  %v773_v49 = vmax.f32 %v771_v60, %v2018_v41  ;;  %v802_v43 = vmax.f32 %v800_v3, %v2025_v55 }
 0x181   : > { %v803_v25 = vmax.f32 %v801_v20, %v2027_v21 }
 0x185   : > { %v655_v1 = vpop.f32.mrf.mxu2 }
 0x186   : > { %v747_v6 = vpop.f32.mrf.mxu3  ;;  %v2031_v38 = vadd.f32 %v655_v1, %v486_v47 }
 0x187   : > { %v2035_v33 = vadd.f32 %v747_v6, %v486_v47 }
 0x188   : > { %v774_v35 = vmax.f32 %v772_v62, %v2031_v38 }
 0x189   : > { %v804_v6 = vmax.f32 %v802_v43, %v2035_v33 }
 0x18d   : > { %v658_v63 = vpop.f32.mrf.mxu2 }
 0x18e   : > { %v2039_v16 = vadd.f32 %v658_v63, %v491_v11  ;;  %v750_v24 = vpop.f32.mrf.mxu3 }
 0x18f   : > { %v2043_v1 = vadd.f32 %v750_v24, %v491_v11 }
 0x190   : > { %v775_v44 = vmax.f32 %v773_v49, %v2039_v16 }
 0x191   : > { %v805_v17 = vmax.f32 %v803_v25, %v2043_v1 }
 0x192   : > { %v776_v12 = vmax.f32 %v775_v44, %v774_v35 }
 0x193   : > { %v806_v40 = vmax.f32 %v805_v17, %v804_v6 }
 0x194   : > { %v777_v47 = vrot.slane %v776_v12, 4 }
 0x195   : > { %v807_v14 = vrot.slane %v806_v40, 4 }
 0x196   : > { %v778_v60 = vmax.f32 %v776_v12, %v777_v47 }
 0x197   : > { %v808_v63 = vmax.f32 %v806_v40, %v807_v14 }
 0x198   : > { %v779_v28 = vrot.slane %v778_v60, 2 }
 0x199   : > { %v809_v3 = vrot.slane %v808_v63, 2 }
 0x19a   : > { %v780_v55 = vmax.f32 %v778_v60, %v779_v28 }
 0x19b   : > { %v810_v20 = vmax.f32 %v808_v63, %v809_v3 }
 0x19c   : > { %v781_v11 = vrot.slane %v780_v55, 1 }
 0x19d   : > { %v811_v62 = vrot.slane %v810_v20, 1 }
 0x19e   : > { %v2049_v24 = vmax.f32 %v780_v55, %v781_v11 }
 0x19f   : > { %v2059_v44 = vmax.f32 %v810_v20, %v811_v62 }
 0x1a0   : > { %v813_v49 = vsub.f32 %v1908_v8, %v2049_v24  ;;  %v815_v43 = vsub.f32 %v1884_v50, %v2049_v24  ;;  %v817_v25 = vsub.f32 %v1900_v61, %v2049_v24  ;;  %v835_v35 = vsub.f32 %v1921_v23, %v2049_v24 }
 0x1a1   : > { %v837_v28 = vsub.f32 %v1970_v29, %v2049_v24  ;;  %v839_v55 = vsub.f32 %v1935_v39, %v2049_v24  ;;  %v841_v8 = vsub.f32 %v1978_v5, %v2049_v24  ;;  %v843_v50 = vsub.f32 %v1952_v53, %v2049_v24 }
 0x1a2   : > { %v819_v61 = vsub.f32 %v1886_v51, %v2049_v24  ;;  %v863_v6 = vmul.f32 1.442695, %v813_v49  ;;  %v867_v17 = vmul.f32 1.442695, %v815_v43  ;;  %v821_v23 = vsub.f32 %v1910_v9, %v2049_v24 }
 0x1a3   : > { %v871_v12 = vmul.f32 1.442695, %v817_v25  ;;  %v814_v29 = vsub.f32 %v1840_v4, %v2059_v44  ;;  %v823_v39 = vsub.f32 %v1888_v54, %v2049_v24  ;;  %v825_v47 = vsub.f32 %v1925_v2, %v2049_v24 }
 0x1a4   : > { %1352 = vpow2.f32 %v863_v6  ;;  %v875_v40 = vmul.f32 1.442695, %v819_v61  ;;  %v879_v51 = vmul.f32 1.442695, %v821_v23  ;;  %v827_v14 = vsub.f32 %v1894_v58, %v2049_v24 }
 0x1a5   : > { %1354 = vpow2.f32 %v867_v17  ;;  %v883_v9 = vmul.f32 1.442695, %v823_v39  ;;  %v829_v4 = vsub.f32 %v1938_v42, %v2049_v24  ;;  %v816_v54 = vsub.f32 %v1846_v10, %v2059_v44 }
 0x1a6   : > { %1356 = vpow2.f32 %v871_v12  ;;  %v818_v63 = vsub.f32 %v1852_v15, %v2059_v44  ;;  %v887_v2 = vmul.f32 1.442695, %v825_v47  ;;  %v820_v58 = vsub.f32 %v1860_v22, %v2059_v44 }
 0x1a7   : > { %1358 = vpow2.f32 %v875_v40  ;;  %v831_v42 = vsub.f32 %v1913_v19, %v2049_v24  ;;  %v833_v10 = vsub.f32 %v1962_v7, %v2049_v24  ;;  %v891_v15 = vmul.f32 1.442695, %v827_v14 }
 0x1a8   : > { %1360 = vpow2.f32 %v879_v51  ;;  %v895_v62 = vmul.f32 1.442695, %v829_v4  ;;  %v836_v43 = vsub.f32 %v1929_v31, %v2059_v44  ;;  %v838_v22 = vsub.f32 %v1974_v26, %v2059_v44 }
 0x1a9   : > { %1362 = vpow2.f32 %v883_v9  ;;  %v840_v19 = vsub.f32 %v1942_v45, %v2059_v44  ;;  %v842_v7 = vsub.f32 %v1982_v48, %v2059_v44  ;;  %v844_v61 = vsub.f32 %v1957_v18, %v2059_v44 }
 0x1aa   : > { %v2081_v60 = vpop.eup %1352  ;;  %1364 = vpow2.f32 %v887_v2  ;;  %v899_v23 = vmul.f32 1.442695, %v831_v42  ;;  %v903_v40 = vmul.f32 1.442695, %v833_v10  ;;  %v907_v14 = vmul.f32 1.442695, %v835_v35 }
 0x1ab   : > { %v2089_v3 = vpop.eup %1354  ;;  %1366 = vpow2.f32 %v891_v15  ;;  %v911_v2 = vmul.f32 1.442695, %v837_v28  ;;  %v845_v35 = vsub.f32 %v1988_v52, %v2049_v24  ;;  %v919_v28 = vmul.f32 1.442695, %v841_v8 }
 0x1ac   : > { %v963_v20 = vadd.f32 %v2089_v3, %v2081_v60  ;;  %v2095_v11 = vpop.eup %1356  ;;  %1368 = vpow2.f32 %v895_v62  ;;  %v865_v62 = vmul.f32 1.442695, %v814_v29  ;;  %v873_v29 = vmul.f32 1.442695, %v818_v63 }
 0x1ad   : > { %v2106_v25 = vpop.eup %1358  ;;  %1370 = vpow2.f32 %v899_v23  ;;  %v822_v23 = vsub.f32 %v1915_v13, %v2059_v44  ;;  %v923_v52 = vmul.f32 1.442695, %v843_v50  ;;  %v824_v8 = vsub.f32 %v1890_v56, %v2059_v44 }
 0x1ae   : > { %v964_v49 = vadd.f32 %v2095_v11, %v963_v20  ;;  %v2115_v17 = vpop.eup %1360  ;;  %1372 = vpow2.f32 %v903_v40  ;;  %v915_v20 = vmul.f32 1.442695, %v839_v55  ;;  %v877_v40 = vmul.f32 1.442695, %v820_v58 }
 0x1af   : > { %v2118_v39 = vpop.eup %1362  ;;  %1374 = vpow2.f32 %v907_v14  ;;  %v849_v13 = vsub.f32 %v1999_v37, %v2049_v24  ;;  %v927_v63 = vmul.f32 1.442695, %v845_v35  ;;  %v826_v53 = vsub.f32 %v1931_v34, %v2059_v44 }
 0x1b0   : > { %v965_v6 = vadd.f32 %v2106_v25, %v964_v49  ;;  %v2121_v51 = vpop.eup %1364  ;;  %v869_v49 = vmul.f32 1.442695, %v816_v54  ;;  %1376 = vpow2.f32 %v911_v2  ;;  %v847_v54 = vsub.f32 %v1996_v27, %v2049_v24 }
 0x1b1   : > { %v2124_v4 = vpop.eup %1366  ;;  %1378 = vpow2.f32 %v915_v20  ;;  %v881_v50 = vmul.f32 1.442695, %v822_v23  ;;  %v851_v56 = vsub.f32 %v2012_v32, %v2049_v24  ;;  %v828_v2 = vsub.f32 %v1896_v59, %v2059_v44 }
 0x1b2   : > { %v966_v12 = vadd.f32 %v2115_v17, %v965_v6  ;;  %v2127_v15 = vpop.eup %1368  ;;  %1380 = vpow2.f32 %v865_v62  ;;  %v931_v58 = vmul.f32 1.442695, %v847_v54  ;;  %v885_v20 = vmul.f32 1.442695, %v824_v8  ;;  %v2488_v54 = vld [vmem:[#allocation5_spill] sm:$0xff] }
 0x1b3   : > { %v2130_v6 = vpop.eup %1370  ;;  %1382 = vpow2.f32 %v869_v49  ;;  %v853_v34 = vsub.f32 %v2014_v46, %v2049_v24  ;;  %v935_v62 = vmul.f32 1.442695, %v849_v13  ;;  %v830_v49 = vsub.f32 %v1948_v36, %v2059_v44 }
 0x1b4   : > { %v967_v47 = vadd.f32 %v2118_v39, %v966_v12  ;;  %v2140_v12 = vpop.eup %1372  ;;  %1384 = vpow2.f32 %v919_v28  ;;  %v889_v35 = vmul.f32 1.442695, %v826_v53  ;;  %v855_v59 = vsub.f32 %v2016_v30, %v2049_v24 }
 0x1b5   : > { %1386 = vpow2.f32 %v873_v29  ;;  %v893_v36 = vmul.f32 1.442695, %v828_v2  ;;  %v857_v8 = vsub.f32 %v2018_v41, %v2049_v24  ;;  %v943_v30 = vmul.f32 1.442695, %v853_v34 }
 0x1b6   : > { %v968_v9 = vadd.f32 %v2121_v51, %v967_v47  ;;  %v2150_v47 = vpop.eup %1374  ;;  %1388 = vpow2.f32 %v923_v52  ;;  %v832_v52 = vsub.f32 %v2488_v54, %v2059_v44  ;;  %v947_v41 = vmul.f32 1.442695, %v855_v59 }
 0x1b7   : > { %v2157_v14 = vpop.eup %1376  ;;  %1390 = vpow2.f32 %v877_v40 }
 0x1b8   : > { %v969_v42 = vadd.f32 %v2124_v4, %v968_v9  ;;  %v2161_v9 = vpop.eup %1378  ;;  %1392 = vpow2.f32 %v927_v63  ;;  %v901_v34 = vmul.f32 1.442695, %v832_v52 }
 0x1b9   : > { %1394 = vpow2.f32 %v881_v50  ;;  %v897_v50 = vmul.f32 1.442695, %v830_v49  ;;  %v951_v49 = vmul.f32 1.442695, %v857_v8 }
 0x1ba   : > { %v970_v10 = vadd.f32 %v2127_v15, %v969_v42  ;;  %v2166_v42 = vpop.eup %1380  ;;  %1396 = vpow2.f32 %v931_v58  ;;  %v859_v58 = vsub.f32 %v2031_v38, %v2049_v24 }
 0x1bb   : > { %1398 = vpow2.f32 %v885_v20 }
 0x1bc   : > { %v971_v55 = vadd.f32 %v2130_v6, %v970_v10  ;;  %v2170_v10 = vpop.eup %1382  ;;  %1400 = vpow2.f32 %v935_v62 }
 0x1bd   : > { %v2175_v28 = vpop.eup %1384  ;;  %v993_v46 = vadd.f32 %v2170_v10, %v2166_v42  ;;  %1402 = vpow2.f32 %v889_v35 }
 0x1be   : > { %v972_v5 = vadd.f32 %v2140_v12, %v971_v55  ;;  %v939_v55 = vmul.f32 1.442695, %v851_v56  ;;  %v2181_v23 = vpop.eup %1386 }
 0x1bf   : > { %v994_v40 = vadd.f32 %v2181_v23, %v993_v46 }
 0x1c0   : > { %v973_v27 = vadd.f32 %v2150_v47, %v972_v5  ;;  %v2186_v5 = vpop.eup %1388  ;;  %1404 = vpow2.f32 %v939_v55 }
 0x1c1   : > { %v2191_v13 = vpop.eup %1390  ;;  %1406 = vpow2.f32 %v893_v36 }
 0x1c2   : > { %v974_v37 = vadd.f32 %v2157_v14, %v973_v27  ;;  %v2489_v27 = vld [vmem:[#allocation6_spill] sm:$0xff]  ;;  %v2196_v56 = vpop.eup %1392  ;;  %1408 = vpow2.f32 %v943_v30 }
 0x1c3   : > { %v834_v53 = vsub.f32 %v2489_v27, %v2059_v44  ;;  %v2201_v2 = vpop.eup %1394  ;;  %1410 = vpow2.f32 %v897_v50  ;;  %v913_v27 = vmul.f32 1.442695, %v838_v22 }
 0x1c4   : > { %v975_v32 = vadd.f32 %v2161_v9, %v974_v37  ;;  %v995_v37 = vadd.f32 %v2191_v13, %v994_v40  ;;  %v2204_v62 = vpop.eup %1396  ;;  %1412 = vpow2.f32 %v947_v41 }
 0x1c5   : > { %v2209_v38 = vpop.eup %1398  ;;  %v905_v55 = vmul.f32 1.442695, %v834_v53  ;;  %1414 = vpow2.f32 %v901_v34 }
 0x1c6   : > { %v976_v29 = vadd.f32 %v2175_v28, %v975_v32  ;;  %v861_v32 = vsub.f32 %v2039_v16, %v2049_v24  ;;  %v996_v35 = vadd.f32 %v2201_v2, %v995_v37  ;;  %v2212_v46 = vpop.eup %1400  ;;  %v909_v24 = vmul.f32 1.442695, %v836_v43 }
 0x1c7   : > { %v2215_v52 = vpop.eup %1402  ;;  %1416 = vpow2.f32 %v951_v49 }
 0x1c8   : > { %v977_v63 = vadd.f32 %v2186_v5, %v976_v29  ;;  %v955_v29 = vmul.f32 1.442695, %v859_v58  ;;  %v997_v54 = vadd.f32 %v2209_v38, %v996_v35  ;;  %v2221_v36 = vpop.eup %1404  ;;  %v959_v8 = vmul.f32 1.442695, %v861_v32 }
 0x1c9   : > { %v2224_v40 = vpop.eup %1406  ;;  %1418 = vpow2.f32 %v905_v55  ;;  %v917_v58 = vmul.f32 1.442695, %v840_v19  ;;  %v921_v32 = vmul.f32 1.442695, %v842_v7  ;;  %v925_v55 = vmul.f32 1.442695, %v844_v61 }
 0x1ca   : > { %v978_v20 = vadd.f32 %v2196_v56, %v977_v63  ;;  %v998_v30 = vadd.f32 %v2215_v52, %v997_v54  ;;  %v2230_v53 = vpop.eup %1408  ;;  %1420 = vpow2.f32 %v955_v29  ;;  %v852_v61 = vsub.f32 %v2021_v57, %v2059_v44 }
 0x1cb   : > { %v2233_v43 = vpop.eup %1410  ;;  %1422 = vpow2.f32 %v909_v24 }
 0x1cc   : > { %v979_v59 = vadd.f32 %v2204_v62, %v978_v20  ;;  %v999_v31 = vadd.f32 %v2224_v40, %v998_v30  ;;  %v2239_v41 = vpop.eup %1412  ;;  %1424 = vpow2.f32 %v959_v8  ;;  %v2490_v20 = vld [vmem:[#allocation7_spill] sm:$0xff] }
 0x1cd   : > { %v2242_v22 = vpop.eup %1414  ;;  %v846_v34 = vsub.f32 %v2490_v20, %v2059_v44  ;;  %1426 = vpow2.f32 %v913_v27 }
 0x1ce   : > { %v980_v16 = vadd.f32 %v2212_v46, %v979_v59  ;;  %v1000_v26 = vadd.f32 %v2233_v43, %v999_v31  ;;  %v2250_v49 = vpop.eup %1416  ;;  %v848_v59 = vsub.f32 %v2002_v0, %v2059_v44  ;;  %1428 = vpow2.f32 %v917_v58 }
 0x1cf   : > { %v2253_v19 = vpop.eup %1418  ;;  %1430 = vpow2.f32 %v921_v32  ;;  %v929_v8 = vmul.f32 1.442695, %v846_v34 }
 0x1d0   : > { %v981_v63 = vadd.f32 %v2221_v36, %v980_v16  ;;  %v1001_v45 = vadd.f32 %v2242_v22, %v1000_v26  ;;  %v2261_v29 = vpop.eup %1420  ;;  %v2491_v16 = vld [vmem:[#allocation8_spill] sm:$0xff]  ;;  %1432 = vpow2.f32 %v925_v55  ;;  %v933_v27 = vmul.f32 1.442695, %v848_v59  ;;  %v2492_v26 = vld [vmem:[#allocation9_spill] sm:$0xff] }
 0x1d1   : > { %v2264_v7 = vpop.eup %1422  ;;  %v850_v24 = vsub.f32 %v2491_v16, %v2059_v44  ;;  %1434 = vpow2.f32 %v929_v8  ;;  %v941_v59 = vmul.f32 1.442695, %v852_v61 }
 0x1d2   : > { %v982_v50 = vadd.f32 %v2230_v53, %v981_v63  ;;  %v1002_v48 = vadd.f32 %v2253_v19, %v1001_v45  ;;  %v2269_v30 = vpop.eup %1424  ;;  %1436 = vpow2.f32 %v933_v27  ;;  %v858_v27 = vsub.f32 %v2027_v21, %v2059_v44 }
 0x1d3   : > { %v2272_v63 = vpop.eup %1426  ;;  %v937_v20 = vmul.f32 1.442695, %v850_v24 }
 0x1d4   : > { %v983_v37 = vadd.f32 %v2239_v41, %v982_v50  ;;  %v1003_v0 = vadd.f32 %v2264_v7, %v1002_v48  ;;  %v2278_v50 = vpop.eup %1428  ;;  %v953_v21 = vmul.f32 1.442695, %v858_v27 }
 0x1d5   : > { %v2283_v32 = vpop.eup %1430  ;;  %1438 = vpow2.f32 %v937_v20 }
 0x1d6   : > { %v984_v35 = vadd.f32 %v2250_v49, %v983_v37  ;;  %v1004_v31 = vadd.f32 %v2272_v63, %v1003_v0  ;;  %v854_v37 = vsub.f32 %v2492_v26, %v2059_v44  ;;  %v2288_v48 = vpop.eup %1432  ;;  %1440 = vpow2.f32 %v941_v59 }
 0x1d7   : > { %v2291_v24 = vpop.eup %1434  ;;  %v860_v26 = vsub.f32 %v2035_v33, %v2059_v44 }
 0x1d8   : > { %v985_v54 = vadd.f32 %v2261_v29, %v984_v35  ;;  %v1005_v34 = vadd.f32 %v2278_v50, %v1004_v31  ;;  %v2493_v35 = vld [vmem:[#allocation10_spill] sm:$0xff]  ;;  %v945_v16 = vmul.f32 1.442695, %v854_v37 }
 0x1d9   : > { %v856_v57 = vsub.f32 %v2493_v35, %v2059_v44  ;;  %v957_v59 = vmul.f32 1.442695, %v860_v26 }
 0x1da   : > { %v986_v18 = vadd.f32 %v2269_v30, %v985_v54  ;;  %v1006_v55 = vadd.f32 %v2283_v32, %v1005_v34  ;;  %1442 = vpow2.f32 %v945_v16 }
 0x1dc   : > { %v987_v58 = vrot.slane %v986_v18, 4  ;;  %v1007_v8 = vadd.f32 %v2288_v48, %v1006_v55 }
 0x1de   : > { %v988_v45 = vadd.f32 %v987_v58, %v986_v18  ;;  %v949_v18 = vmul.f32 1.442695, %v856_v57  ;;  %v1008_v31 = vadd.f32 %v2291_v24, %v1007_v8  ;;  %v2294_v58 = vpop.eup %1436 }
 0x1df   : > { %v2301_v20 = vpop.eup %1438 }
 0x1e0   : > { %v989_v54 = vrot.slane %v988_v45, 2  ;;  %v1009_v37 = vadd.f32 %v2294_v58, %v1008_v31  ;;  %1444 = vpow2.f32 %v949_v18  ;;  %v2307_v57 = vpop.eup %1440 }
 0x1e1   : > { %v2310_v33 = vpop.eup %1442 }
 0x1e2   : > { %v990_v0 = vadd.f32 %v989_v54, %v988_v45  ;;  %v862_v45 = vsub.f32 %v2043_v1, %v2059_v44  ;;  %v1010_v35 = vadd.f32 %v2301_v20, %v1009_v37 }
 0x1e4   : > { %v991_v61 = vrot.slane %v990_v0, 1  ;;  %v1011_v55 = vadd.f32 %v2307_v57, %v1010_v35  ;;  %v961_v54 = vmul.f32 1.442695, %v862_v45 }
 0x1e6   : > { %v992_v34 = vadd.f32 %v991_v61, %v990_v0  ;;  %v1012_v16 = vadd.f32 %v2310_v33, %v1011_v55  ;;  %v2315_v8 = vpop.eup %1444 }
 0x1e8   : > { %1446 = vrcp.f32 %v992_v34  ;;  %v1013_v1 = vadd.f32 %v2315_v8, %v1012_v16 }
 0x1e9   : > { %1448 = vpow2.f32 %v953_v21 }
 0x1ea   : > { %1450 = vpow2.f32 %v957_v59 }
 0x1eb   : > { %1452 = vpow2.f32 %v961_v54 }
 0x1ee   : > { %v1447_v44 = vpop.eup %1446 }
 0x1ef   : > { %v1025_v0 = vmul.f32 %v1447_v44, %v2081_v60  ;;  %v1027_v18 = vmul.f32 %v1447_v44, %v2089_v3  ;;  %v1029_v31 = vmul.f32 %v1447_v44, %v2095_v11  ;;  %v1031_v61 = vmul.f32 %v1447_v44, %v2106_v25  ;;  %v2333_v11 = vpop.eup %1448 }
 0x1f0   : > { %v1033_v27 = vmul.f32 %v1447_v44, %v2115_v17  ;;  %v1035_v26 = vmul.f32 %v1447_v44, %v2118_v39  ;;  %v1037_v37 = vmul.f32 %v1447_v44, %v2121_v51  ;;  %v1039_v34 = vmul.f32 %v1447_v44, %v2124_v4  ;;  %v2340_v4 = vpop.eup %1450 }
 0x1f1   : > { %v1041_v45 = vmul.f32 %v1447_v44, %v2127_v15  ;;  %v1043_v35 = vmul.f32 %v1447_v44, %v2130_v6  ;;  %v1045_v60 = vmul.f32 %v1447_v44, %v2140_v12  ;;  %v1047_v3 = vmul.f32 %v1447_v44, %v2150_v47  ;;  %1075 = vst [vmem:[%s2330_s13] sm:$0xff] %v1025_v0 }
 0x1f2   : > { %v1049_v25 = vmul.f32 %v1447_v44, %v2157_v14  ;;  %v1051_v17 = vmul.f32 %v1447_v44, %v2161_v9  ;;  %v1053_v39 = vmul.f32 %v1447_v44, %v2175_v28  ;;  %v1055_v51 = vmul.f32 %v1447_v44, %v2186_v5  ;;  %1077 = vst [vmem:[%s2330_s13 + $0x10] sm:$0xff] %v1027_v18  ;;  %v2347_v14 = vpop.eup %1452 }
 0x1f3   : > { %v1057_v15 = vmul.f32 %v1447_v44, %v2196_v56  ;;  %v1059_v6 = vmul.f32 %v1447_v44, %v2204_v62  ;;  %v1061_v12 = vmul.f32 %v1447_v44, %v2212_v46  ;;  %v1063_v47 = vmul.f32 %v1447_v44, %v2221_v36  ;;  %1079 = vst [vmem:[%s2330_s13 + $0x20] sm:$0xff] %v1029_v31 }
 0x1f4   : > { %v1065_v9 = vmul.f32 %v1447_v44, %v2230_v53  ;;  %v1067_v28 = vmul.f32 %v1447_v44, %v2239_v41  ;;  %v1069_v5 = vmul.f32 %v1447_v44, %v2250_v49  ;;  %v1071_v56 = vmul.f32 %v1447_v44, %v2261_v29  ;;  %1081 = vst [vmem:[%s2330_s13 + $0x30] sm:$0xff] %v1031_v61 }
 0x1f5   : > { %v1073_v62 = vmul.f32 %v1447_v44, %v2269_v30  ;;  %1083 = vst [vmem:[%s2330_s13 + $0x40] sm:$0xff] %v1033_v27  ;;  %v1014_v46 = vadd.f32 %v2333_v11, %v1013_v1 }
 0x1f6   : > { %1085 = vst [vmem:[%s2330_s13 + $0x50] sm:$0xff] %v1035_v26 }
 0x1f7   : > { %1087 = vst [vmem:[%s2330_s13 + $0x60] sm:$0xff] %v1037_v37  ;;  %v1015_v36 = vadd.f32 %v2340_v4, %v1014_v46 }
 0x1f8   : > { %1089 = vst [vmem:[%s2330_s13 + $0x70] sm:$0xff] %v1039_v34 }
 0x1f9   : > { %1091 = vst [vmem:[%s2330_s13 + $0x80] sm:$0xff] %v1041_v45  ;;  %v1016_v53 = vadd.f32 %v2347_v14, %v1015_v36 }
 0x1fa   : > { %1093 = vst [vmem:[%s2330_s13 + $0x90] sm:$0xff] %v1043_v35 }
 0x1fb   : > { %1095 = vst [vmem:[%s2330_s13 + $0xa0] sm:$0xff] %v1045_v60  ;;  %v1017_v41 = vrot.slane %v1016_v53, 4 }
 0x1fc   : > { %1097 = vst [vmem:[%s2330_s13 + $0xb0] sm:$0xff] %v1047_v3 }
 0x1fd   : > { %1099 = vst [vmem:[%s2330_s13 + $0xc0] sm:$0xff] %v1049_v25  ;;  %v1018_v49 = vadd.f32 %v1017_v41, %v1016_v53 }
 0x1fe   : > { %1101 = vst [vmem:[%s2330_s13 + $0xd0] sm:$0xff] %v1051_v17 }
 0x1ff   : > { %1103 = vst [vmem:[%s2330_s13 + $0xe0] sm:$0xff] %v1053_v39  ;;  %v1019_v29 = vrot.slane %v1018_v49, 2 }
 0x200   : > { %1105 = vst [vmem:[%s2330_s13 + $0xf0] sm:$0xff] %v1055_v51 }
 0x201   : > { %1107 = vst [vmem:[%s2330_s13 + $0x100] sm:$0xff] %v1057_v15  ;;  %v1020_v30 = vadd.f32 %v1019_v29, %v1018_v49 }
 0x202   : > { %1109 = vst [vmem:[%s2330_s13 + $0x110] sm:$0xff] %v1059_v6 }
 0x203   : > { %1111 = vst [vmem:[%s2330_s13 + $0x120] sm:$0xff] %v1061_v12  ;;  %v1021_v21 = vrot.slane %v1020_v30, 1 }
 0x204   : > { %1113 = vst [vmem:[%s2330_s13 + $0x130] sm:$0xff] %v1063_v47 }
 0x205   : > { %1115 = vst [vmem:[%s2330_s13 + $0x140] sm:$0xff] %v1065_v9  ;;  %v1022_v59 = vadd.f32 %v1021_v21, %v1020_v30 }
 0x206   : > { %1117 = vst [vmem:[%s2330_s13 + $0x150] sm:$0xff] %v1067_v28 }
 0x207   : > { %1119 = vst [vmem:[%s2330_s13 + $0x160] sm:$0xff] %v1069_v5  ;;  %1454 = vrcp.f32 %v1022_v59 }
 0x208   : > { %1121 = vst [vmem:[%s2330_s13 + $0x170] sm:$0xff] %v1071_v56 }
 0x209   : > { %1123 = vst [vmem:[%s2330_s13 + $0x180] sm:$0xff] %v1073_v62 }
 0x20d   : > { %v1455_v55 = vpop.eup %1454 }
 0x20e   : > { %v1026_v54 = vmul.f32 %v1455_v55, %v2166_v42  ;;  %v1028_v16 = vmul.f32 %v1455_v55, %v2170_v10  ;;  %v1030_v1 = vmul.f32 %v1455_v55, %v2181_v23  ;;  %v1032_v44 = vmul.f32 %v1455_v55, %v2191_v13 }
 0x20f   : > { %v1034_v0 = vmul.f32 %v1455_v55, %v2201_v2  ;;  %v1036_v18 = vmul.f32 %v1455_v55, %v2209_v38  ;;  %v1038_v31 = vmul.f32 %v1455_v55, %v2215_v52  ;;  %v1040_v61 = vmul.f32 %v1455_v55, %v2224_v40 }
 0x210   : > { %v1042_v27 = vmul.f32 %v1455_v55, %v2233_v43  ;;  %v1044_v42 = vmul.f32 %v1455_v55, %v2242_v22  ;;  %v1046_v10 = vmul.f32 %v1455_v55, %v2253_v19  ;;  %v1048_v26 = vmul.f32 %v1455_v55, %v2264_v7  ;;  %1076 = vst [vmem:[%s2330_s13 + $0x8] sm:$0xff] %v1026_v54 }
 0x211   : > { %v1050_v23 = vmul.f32 %v1455_v55, %v2272_v63  ;;  %v1052_v13 = vmul.f32 %v1455_v55, %v2278_v50  ;;  %v1054_v2 = vmul.f32 %v1455_v55, %v2283_v32  ;;  %v1056_v38 = vmul.f32 %v1455_v55, %v2288_v48  ;;  %1078 = vst [vmem:[%s2330_s13 + $0x18] sm:$0xff] %v1028_v16 }
 0x212   : > { %v1058_v52 = vmul.f32 %v1455_v55, %v2291_v24  ;;  %v1060_v40 = vmul.f32 %v1455_v55, %v2294_v58  ;;  %v1062_v43 = vmul.f32 %v1455_v55, %v2301_v20  ;;  %v1064_v22 = vmul.f32 %v1455_v55, %v2307_v57  ;;  %1080 = vst [vmem:[%s2330_s13 + $0x28] sm:$0xff] %v1030_v1 }
 0x213   : > { %v1066_v19 = vmul.f32 %v1455_v55, %v2310_v33  ;;  %v1068_v7 = vmul.f32 %v1455_v55, %v2315_v8  ;;  %v1070_v63 = vmul.f32 %v1455_v55, %v2333_v11  ;;  %v1072_v50 = vmul.f32 %v1455_v55, %v2340_v4  ;;  %1082 = vst [vmem:[%s2330_s13 + $0x38] sm:$0xff] %v1032_v44 }
 0x214   : > { %v1074_v32 = vmul.f32 %v1455_v55, %v2347_v14  ;;  %1084 = vst [vmem:[%s2330_s13 + $0x48] sm:$0xff] %v1034_v0 }
 0x215   : > { %1086 = vst [vmem:[%s2330_s13 + $0x58] sm:$0xff] %v1036_v18 }
 0x216   : > { %1088 = vst [vmem:[%s2330_s13 + $0x68] sm:$0xff] %v1038_v31 }
 0x217   : > { %1090 = vst [vmem:[%s2330_s13 + $0x78] sm:$0xff] %v1040_v61 }
 0x218   : > { %1092 = vst [vmem:[%s2330_s13 + $0x88] sm:$0xff] %v1042_v27 }
 0x219   : > { %1094 = vst [vmem:[%s2330_s13 + $0x98] sm:$0xff] %v1044_v42 }
 0x21a   : > { %1096 = vst [vmem:[%s2330_s13 + $0xa8] sm:$0xff] %v1046_v10 }
 0x21b   : > { %1098 = vst [vmem:[%s2330_s13 + $0xb8] sm:$0xff] %v1048_v26 }
 0x21c   : > { %1100 = vst [vmem:[%s2330_s13 + $0xc8] sm:$0xff] %v1050_v23 }
 0x21d   : > { %1102 = vst [vmem:[%s2330_s13 + $0xd8] sm:$0xff] %v1052_v13 }
 0x21e   : > { %1104 = vst [vmem:[%s2330_s13 + $0xe8] sm:$0xff] %v1054_v2 }
 0x21f   : > { %1106 = vst [vmem:[%s2330_s13 + $0xf8] sm:$0xff] %v1056_v38 }
 0x220   : > { %1108 = vst [vmem:[%s2330_s13 + $0x108] sm:$0xff] %v1058_v52 }
 0x221   : > { %1110 = vst [vmem:[%s2330_s13 + $0x118] sm:$0xff] %v1060_v40 }
 0x222   : > { %1112 = vst [vmem:[%s2330_s13 + $0x128] sm:$0xff] %v1062_v43 }
 0x223   : > { %1114 = vst [vmem:[%s2330_s13 + $0x138] sm:$0xff] %v1064_v22 }
 0x224   : > { %1116 = vst [vmem:[%s2330_s13 + $0x148] sm:$0xff] %v1066_v19 }
 0x225   : > { %1118 = vst [vmem:[%s2330_s13 + $0x158] sm:$0xff] %v1068_v7 }
 0x226   : > { %1120 = vst [vmem:[%s2330_s13 + $0x168] sm:$0xff] %v1070_v63 }
 0x227   : > { %1122 = vst [vmem:[%s2330_s13 + $0x178] sm:$0xff] %v1072_v50 }
 0x228   : > { %1124 = vst [vmem:[%s2330_s13 + $0x188] sm:$0xff] %v1074_v32 }
 0x229   : > { %1483 = shalt.err (!%p1480_p5)
}
 0x22a   : > { %s1537_s11 = smov 256   ;;  %s1538_s13 = smov 16  }
 0x22b   : > { %1291 = dma.vmem_to_hbm [thread:$0]  (%p1609_p4), %s1141_s24, 6400, %s1143_s25, %s1126_s21, %s1537_s11, %s1537_s11, %s1538_s13  }
 0x22c PF: > { %p1297_p6 = scmp.ge.s32.totalorder %s1534_s23, 2  ;;  %s1157_s14 = sand.u32 1, %s1514_s18  }
 0x22d   : > { %s1158_s15 = scalar_lea.sflag [#allocation3], %s1157_s14 }
 0x22e   : > { %p1294_p7 = pnand %p1297_p6, %p1616_p8 }
 0x230   : > { %p1295_p9 = pneg %p1294_p7 }
 0x232   : > { %1509 = dma.done.wait (%p1295_p9), %s1158_s15, 6400  }
 0x233   : > { %1511 = vsyncadd (%p1295_p9), %s1158_s15, 4294960896  ;;  %s18_s23 = sadd.s32 1, %s1534_s23   ;;  %s2494_s18 = smov %s1518_s19 }
 0x234   : > { %p15_p10 = scmp.ge.s32.totalorder %s18_s23, 4   ;;  %s2495_s19 = smov %s1522_s20 }
 0x235   : > { %s2496_s20 = smov %s1622_s6  ;;  %s2497_s21 = smov %s1530_s22 }
 0x236   : > { %s2498_s22 = smov %s2500_s26  ;;  %17 = sbr.rel (!%p15_p10) target bundleno = 4 (0x4), region = 75 }
 0x23b   :  { %1164 = vsyncpa [#allocation3], 1 }
 0x23c   :  { %1166 = vsyncpa [#allocation3 + $0x1], 1 }

</bundles_post_ra>
